<compile_context>
chip_gen: v7x
topology: tpu7x:2x2x1
jax: 0.10.0
libtpu: 0.0.40
codegen_flags: <defaults>
</compile_context>

<pallas_src>
import functools
import math

import jax
import jax.numpy as jnp
from jax import lax
from jax.experimental import pallas as pl
from jax.experimental.pallas import tpu as pltpu


def _cross_attention_kernel(x_ref, ctx_ref, wq_ref, wk_ref, wv_ref, wp_ref,
                            o_ref, *, n_head, head_dim, batch_block):
    f32 = jnp.float32
    scale = 1.0 / math.sqrt(head_dim)

    for i in range(batch_block):          # static unroll over batch elements
        x = x_ref[i].astype(f32)          # (T_q,  C)
        ctx = ctx_ref[i].astype(f32)      # (T_kv, C)

        o_acc = None
        for h in range(n_head):           # static unroll over heads
            # Per-head projections straight from the MXU (full-C contraction).
            # Leading-dim ref indexing -> no lane-dim slicing / relayouts.
            qh = jnp.dot(x, wq_ref[h].astype(f32),
                         preferred_element_type=f32)          # (T_q,  D)
            kh = jnp.dot(ctx, wk_ref[h].astype(f32),
                         preferred_element_type=f32)          # (T_kv, D)
            vh = jnp.dot(ctx, wv_ref[h].astype(f32),
                         preferred_element_type=f32)          # (T_kv, D)

            # scores = qh @ kh^T without an explicit transpose.
            s = lax.dot_general(qh, kh, (((1,), (1,)), ((), ())),
                                preferred_element_type=f32) * scale  # (T_q, T_kv)

            # Numerically stable softmax; divide -> reciprocal + multiply.
            s = s - jnp.max(s, axis=-1, keepdims=True)
            p = jnp.exp(s)
            inv = pl.reciprocal(jnp.sum(p, axis=-1, keepdims=True), approx=False)
            p = p * inv

            yh = jnp.dot(p, vh, preferred_element_type=f32)   # (T_q, D)

            # Output projection accumulated per head (no (T_q, C) scratch,
            # no masked sub-lane-width stores).
            contrib = jnp.dot(yh, wp_ref[h].astype(f32),
                              preferred_element_type=f32)     # (T_q, C)
            o_acc = contrib if o_acc is None else o_acc + contrib

        o_ref[i] = o_acc.astype(o_ref.dtype)                  # lane-dense store


def cross_attention_forward(x, context, params, n_head, *, batch_block=None):
    """x: (B, T_q, C), context: (B, T_kv, C). Returns (B, T_q, C) float32."""
    wq, wk, wv, wp = params
    B, T_q, C = x.shape
    _, T_kv, _ = context.shape
    assert C % n_head == 0
    head_dim = C // n_head

    # Fold batch elements into each grid step, but keep >=2 steps so both
    # v7x TensorCores stay busy (no-op on single-TC v5e/v6e).
    if batch_block is None:
        batch_block = max(1, B // 2)
    while B % batch_block:
        batch_block -= 1
    n_steps = B // batch_block

    # Pre-split weights per head once, in plain XLA:
    #   wq_h[h] = Wq[:, h*D:(h+1)*D]  (C, D)  ->  q_h = x @ wq_h[h]
    #   wp_h[h] = Wp[h*D:(h+1)*D, :]  (D, C)  ->  out += y_h @ wp_h[h]
    def split_out_cols(w):
        return w.reshape(C, n_head, head_dim).transpose(1, 0, 2)

    wq_h = split_out_cols(wq)
    wk_h = split_out_cols(wk)
    wv_h = split_out_cols(wv)
    wp_h = wp.reshape(n_head, head_dim, C)

    kernel = functools.partial(_cross_attention_kernel, n_head=n_head,
                               head_dim=head_dim, batch_block=batch_block)

    act_q_spec = pl.BlockSpec((batch_block, T_q, C), lambda b: (b, 0, 0))
    act_kv_spec = pl.BlockSpec((batch_block, T_kv, C), lambda b: (b, 0, 0))
    # Constant index maps -> weights stay VMEM-resident across the grid.
    w_in_spec = pl.BlockSpec((n_head, C, head_dim), lambda b: (0, 0, 0))
    w_out_spec = pl.BlockSpec((n_head, head_dim, C), lambda b: (0, 0, 0))

    flops = 2 * B * (T_q * C * C           # q projection
                     + 2 * T_kv * C * C    # k, v projections
                     + 2 * T_q * T_kv * C  # scores + p@v (summed over heads)
                     + T_q * C * C)        # output projection
    transcendentals = B * n_head * T_q * (T_kv + 1)        # exp + reciprocal
    bytes_accessed = 4 * (x.size + context.size + 4 * C * C + B * T_q * C)

    out = pl.pallas_call(
        kernel,
        out_shape=jax.ShapeDtypeStruct((B, T_q, C), jnp.float32),
        grid=(n_steps,),
        in_specs=[act_q_spec, act_kv_spec,
                  w_in_spec, w_in_spec, w_in_spec, w_out_spec],
        out_specs=pl.BlockSpec((batch_block, T_q, C), lambda b: (b, 0, 0)),
        compiler_params=pltpu.CompilerParams(
            dimension_semantics=("parallel",)),
        cost_estimate=pl.CostEstimate(flops=flops,
                                      transcendentals=transcendentals,
                                      bytes_accessed=bytes_accessed),
    )(x, context, wq_h, wk_h, wv_h, wp_h)
    return out


def _reference_forward(x, context, params, n_head):
    """Plain-JAX reference mirroring the PyTorch CrossAttention module."""
    wq, wk, wv, wp = params
    B, T_q, C = x.shape
    _, T_kv, _ = context.shape
    D = C // n_head

    q = (x @ wq).reshape(B, T_q, n_head, D).transpose(0, 2, 1, 3)
    k = (context @ wk).reshape(B, T_kv, n_head, D).transpose(0, 2, 1, 3)
    v = (context @ wv).reshape(B, T_kv, n_head, D).transpose(0, 2, 1, 3)

    scale = 1.0 / math.sqrt(D)
    s = jnp.einsum("bhqd,bhkd->bhqk", q, k) * scale
    p = jax.nn.softmax(s, axis=-1)
    y = jnp.einsum("bhqk,bhkd->bhqd", p, v)
    y = y.transpose(0, 2, 1, 3).reshape(B, T_q, C)
    return y @ wp


def init_params(key, n_embd):
    """Deterministic synthetic weights, stored (in, out)."""
    k1, k2, k3, k4 = jax.random.split(key, 4)
    scale = 0.02
    wq = jax.random.normal(k1, (n_embd, n_embd), jnp.float32) * scale
    wk = jax.random.normal(k2, (n_embd, n_embd), jnp.float32) * scale
    wv = jax.random.normal(k3, (n_embd, n_embd), jnp.float32) * scale
    wp = jax.random.normal(k4, (n_embd, n_embd), jnp.float32) * scale
    return (wq, wk, wv, wp)


if __name__ == "__main__":
    B = 2
    T_Q = 8
    T_KV = 16
    N_EMBD = 32
    N_HEAD = 4

    key = jax.random.PRNGKey(0)
    kp, kx, kc = jax.random.split(key, 3)
    params = init_params(kp, N_EMBD)
    x = jax.random.normal(kx, (B, T_Q, N_EMBD), jnp.float32)
    context = jax.random.normal(kc, (B, T_KV, N_EMBD), jnp.float32)

    out = cross_attention_forward(x, context, params, N_HEAD)
    out = jax.block_until_ready(out)

    ref = _reference_forward(x, context, params, N_HEAD)
    assert out.shape == (B, T_Q, N_EMBD)
    assert jnp.allclose(out, ref, atol=1e-4, rtol=1e-4), "mismatch vs reference"

    print("KERNEL_OK")
</pallas_src>

<mosaic_0001>
module attributes {stable_mosaic.version = 11 : i64} {
  func.func @_cross_attention_kernel(%arg0: i32, %arg1: memref<1x8x32xf32, #tpu.memory_space<vmem>>, %arg2: memref<1x16x32xf32, #tpu.memory_space<vmem>>, %arg3: memref<4x32x8xf32, #tpu.memory_space<vmem>>, %arg4: memref<4x32x8xf32, #tpu.memory_space<vmem>>, %arg5: memref<4x32x8xf32, #tpu.memory_space<vmem>>, %arg6: memref<4x8x32xf32, #tpu.memory_space<vmem>>, %arg7: memref<1x8x32xf32, #tpu.memory_space<vmem>>) attributes {dimension_semantics = [#tpu.dimension_semantics<parallel>], iteration_bounds = array<i64: 2>, scalar_prefetch = 0 : i64, scratch_operands = 0 : i64, tpu.core_type = #tpu.core_type<tc>, window_params = [{transform_indices = @transform_0, window_bounds = array<i64: 1, 8, 32>}, {transform_indices = @transform_1, window_bounds = array<i64: 1, 16, 32>}, {pipeline_mode = #tpu.pipeline_mode<synchronous>, transform_indices = @transform_2, window_bounds = array<i64: 4, 32, 8>}, {pipeline_mode = #tpu.pipeline_mode<synchronous>, transform_indices = @transform_3, window_bounds = array<i64: 4, 32, 8>}, {pipeline_mode = #tpu.pipeline_mode<synchronous>, transform_indices = @transform_4, window_bounds = array<i64: 4, 32, 8>}, {pipeline_mode = #tpu.pipeline_mode<synchronous>, transform_indices = @transform_5, window_bounds = array<i64: 4, 8, 32>}, {transform_indices = @transform_6, window_bounds = array<i64: 1, 8, 32>}]} {
    %c0 = arith.constant 0 : index
    %c0_0 = arith.constant 0 : index
    %c0_1 = arith.constant 0 : index
    %0 = vector.load %arg1[%c0, %c0_0, %c0_1] : memref<1x8x32xf32, #tpu.memory_space<vmem>>, vector<1x8x32xf32>
    %1 = vector.shape_cast %0 : vector<1x8x32xf32> to vector<8x32xf32>
    %c0_2 = arith.constant 0 : index
    %c0_3 = arith.constant 0 : index
    %c0_4 = arith.constant 0 : index
    %2 = vector.load %arg2[%c0_2, %c0_3, %c0_4] : memref<1x16x32xf32, #tpu.memory_space<vmem>>, vector<1x16x32xf32>
    %3 = vector.shape_cast %2 : vector<1x16x32xf32> to vector<16x32xf32>
    %c0_5 = arith.constant 0 : index
    %c0_6 = arith.constant 0 : index
    %c0_7 = arith.constant 0 : index
    %4 = vector.load %arg3[%c0_5, %c0_6, %c0_7] : memref<4x32x8xf32, #tpu.memory_space<vmem>>, vector<1x32x8xf32>
    %5 = vector.shape_cast %4 : vector<1x32x8xf32> to vector<32x8xf32>
    %cst = arith.constant dense<0.000000e+00> : vector<8x8xf32>
    %6 = tpu.matmul %1, %5, %cst {dimension_numbers = #tpu.dot_dimension_numbers<[1], [0], [0], [1], [0, 0, 1, 1], [], []>} : vector<8x32xf32>, vector<32x8xf32>, vector<8x8xf32> -> vector<8x8xf32>
    %c0_8 = arith.constant 0 : index
    %c0_9 = arith.constant 0 : index
    %c0_10 = arith.constant 0 : index
    %7 = vector.load %arg4[%c0_8, %c0_9, %c0_10] : memref<4x32x8xf32, #tpu.memory_space<vmem>>, vector<1x32x8xf32>
    %8 = vector.shape_cast %7 : vector<1x32x8xf32> to vector<32x8xf32>
    %cst_11 = arith.constant dense<0.000000e+00> : vector<16x8xf32>
    %9 = tpu.matmul %3, %8, %cst_11 {dimension_numbers = #tpu.dot_dimension_numbers<[1], [0], [0], [1], [0, 0, 1, 1], [], []>} : vector<16x32xf32>, vector<32x8xf32>, vector<16x8xf32> -> vector<16x8xf32>
    %c0_12 = arith.constant 0 : index
    %c0_13 = arith.constant 0 : index
    %c0_14 = arith.constant 0 : index
    %10 = vector.load %arg5[%c0_12, %c0_13, %c0_14] : memref<4x32x8xf32, #tpu.memory_space<vmem>>, vector<1x32x8xf32>
    %11 = vector.shape_cast %10 : vector<1x32x8xf32> to vector<32x8xf32>
    %cst_15 = arith.constant dense<0.000000e+00> : vector<16x8xf32>
    %12 = tpu.matmul %3, %11, %cst_15 {dimension_numbers = #tpu.dot_dimension_numbers<[1], [0], [0], [1], [0, 0, 1, 1], [], []>} : vector<16x32xf32>, vector<32x8xf32>, vector<16x8xf32> -> vector<16x8xf32>
    %cst_16 = arith.constant dense<0.000000e+00> : vector<8x16xf32>
    %13 = tpu.matmul %6, %9, %cst_16 {dimension_numbers = #tpu.dot_dimension_numbers<[1], [1], [0], [0], [0, 0, 1, 0], [], []>} : vector<8x8xf32>, vector<16x8xf32>, vector<8x16xf32> -> vector<8x16xf32>
    %cst_17 = arith.constant 0.353553385 : f32
    %14 = vector.broadcast %cst_17 : f32 to vector<8x16xf32>
    %15 = arith.mulf %13, %14 : vector<8x16xf32>
    %cst_18 = arith.constant dense<0xFF800000> : vector<8xf32>
    %16 = vector.multi_reduction <maximumf>, %15, %cst_18 [1] : vector<8x16xf32> to vector<8xf32>
    %17 = vector.shape_cast %16 : vector<8xf32> to vector<8x1xf32>
    %18 = vector.broadcast %17 : vector<8x1xf32> to vector<8x16xf32>
    %19 = arith.subf %15, %18 : vector<8x16xf32>
    %20 = math.exp %19 : vector<8x16xf32>
    %cst_19 = arith.constant dense<0.000000e+00> : vector<8xf32>
    %21 = vector.multi_reduction <add>, %20, %cst_19 [1] : vector<8x16xf32> to vector<8xf32>
    %22 = vector.shape_cast %21 : vector<8xf32> to vector<8x1xf32>
    %23 = tpu.reciprocal %22 : vector<8x1xf32> -> vector<8x1xf32>
    %24 = vector.broadcast %23 : vector<8x1xf32> to vector<8x16xf32>
    %25 = arith.mulf %20, %24 : vector<8x16xf32>
    %cst_20 = arith.constant dense<0.000000e+00> : vector<8x8xf32>
    %26 = tpu.matmul %25, %12, %cst_20 {dimension_numbers = #tpu.dot_dimension_numbers<[1], [0], [0], [1], [0, 0, 1, 1], [], []>} : vector<8x16xf32>, vector<16x8xf32>, vector<8x8xf32> -> vector<8x8xf32>
    %c0_21 = arith.constant 0 : index
    %c0_22 = arith.constant 0 : index
    %c0_23 = arith.constant 0 : index
    %27 = vector.load %arg6[%c0_21, %c0_22, %c0_23] : memref<4x8x32xf32, #tpu.memory_space<vmem>>, vector<1x8x32xf32>
    %28 = vector.shape_cast %27 : vector<1x8x32xf32> to vector<8x32xf32>
    %cst_24 = arith.constant dense<0.000000e+00> : vector<8x32xf32>
    %29 = tpu.matmul %26, %28, %cst_24 {dimension_numbers = #tpu.dot_dimension_numbers<[1], [0], [0], [1], [0, 0, 1, 1], [], []>} : vector<8x8xf32>, vector<8x32xf32>, vector<8x32xf32> -> vector<8x32xf32>
    %c1 = arith.constant 1 : index
    %c0_25 = arith.constant 0 : index
    %c0_26 = arith.constant 0 : index
    %30 = vector.load %arg3[%c1, %c0_25, %c0_26] : memref<4x32x8xf32, #tpu.memory_space<vmem>>, vector<1x32x8xf32>
    %31 = vector.shape_cast %30 : vector<1x32x8xf32> to vector<32x8xf32>
    %cst_27 = arith.constant dense<0.000000e+00> : vector<8x8xf32>
    %32 = tpu.matmul %1, %31, %cst_27 {dimension_numbers = #tpu.dot_dimension_numbers<[1], [0], [0], [1], [0, 0, 1, 1], [], []>} : vector<8x32xf32>, vector<32x8xf32>, vector<8x8xf32> -> vector<8x8xf32>
    %c1_28 = arith.constant 1 : index
    %c0_29 = arith.constant 0 : index
    %c0_30 = arith.constant 0 : index
    %33 = vector.load %arg4[%c1_28, %c0_29, %c0_30] : memref<4x32x8xf32, #tpu.memory_space<vmem>>, vector<1x32x8xf32>
    %34 = vector.shape_cast %33 : vector<1x32x8xf32> to vector<32x8xf32>
    %cst_31 = arith.constant dense<0.000000e+00> : vector<16x8xf32>
    %35 = tpu.matmul %3, %34, %cst_31 {dimension_numbers = #tpu.dot_dimension_numbers<[1], [0], [0], [1], [0, 0, 1, 1], [], []>} : vector<16x32xf32>, vector<32x8xf32>, vector<16x8xf32> -> vector<16x8xf32>
    %c1_32 = arith.constant 1 : index
    %c0_33 = arith.constant 0 : index
    %c0_34 = arith.constant 0 : index
    %36 = vector.load %arg5[%c1_32, %c0_33, %c0_34] : memref<4x32x8xf32, #tpu.memory_space<vmem>>, vector<1x32x8xf32>
    %37 = vector.shape_cast %36 : vector<1x32x8xf32> to vector<32x8xf32>
    %cst_35 = arith.constant dense<0.000000e+00> : vector<16x8xf32>
    %38 = tpu.matmul %3, %37, %cst_35 {dimension_numbers = #tpu.dot_dimension_numbers<[1], [0], [0], [1], [0, 0, 1, 1], [], []>} : vector<16x32xf32>, vector<32x8xf32>, vector<16x8xf32> -> vector<16x8xf32>
    %cst_36 = arith.constant dense<0.000000e+00> : vector<8x16xf32>
    %39 = tpu.matmul %32, %35, %cst_36 {dimension_numbers = #tpu.dot_dimension_numbers<[1], [1], [0], [0], [0, 0, 1, 0], [], []>} : vector<8x8xf32>, vector<16x8xf32>, vector<8x16xf32> -> vector<8x16xf32>
    %cst_37 = arith.constant 0.353553385 : f32
    %40 = vector.broadcast %cst_37 : f32 to vector<8x16xf32>
    %41 = arith.mulf %39, %40 : vector<8x16xf32>
    %cst_38 = arith.constant dense<0xFF800000> : vector<8xf32>
    %42 = vector.multi_reduction <maximumf>, %41, %cst_38 [1] : vector<8x16xf32> to vector<8xf32>
    %43 = vector.shape_cast %42 : vector<8xf32> to vector<8x1xf32>
    %44 = vector.broadcast %43 : vector<8x1xf32> to vector<8x16xf32>
    %45 = arith.subf %41, %44 : vector<8x16xf32>
    %46 = math.exp %45 : vector<8x16xf32>
    %cst_39 = arith.constant dense<0.000000e+00> : vector<8xf32>
    %47 = vector.multi_reduction <add>, %46, %cst_39 [1] : vector<8x16xf32> to vector<8xf32>
    %48 = vector.shape_cast %47 : vector<8xf32> to vector<8x1xf32>
    %49 = tpu.reciprocal %48 : vector<8x1xf32> -> vector<8x1xf32>
    %50 = vector.broadcast %49 : vector<8x1xf32> to vector<8x16xf32>
    %51 = arith.mulf %46, %50 : vector<8x16xf32>
    %cst_40 = arith.constant dense<0.000000e+00> : vector<8x8xf32>
    %52 = tpu.matmul %51, %38, %cst_40 {dimension_numbers = #tpu.dot_dimension_numbers<[1], [0], [0], [1], [0, 0, 1, 1], [], []>} : vector<8x16xf32>, vector<16x8xf32>, vector<8x8xf32> -> vector<8x8xf32>
    %c1_41 = arith.constant 1 : index
    %c0_42 = arith.constant 0 : index
    %c0_43 = arith.constant 0 : index
    %53 = vector.load %arg6[%c1_41, %c0_42, %c0_43] : memref<4x8x32xf32, #tpu.memory_space<vmem>>, vector<1x8x32xf32>
    %54 = vector.shape_cast %53 : vector<1x8x32xf32> to vector<8x32xf32>
    %cst_44 = arith.constant dense<0.000000e+00> : vector<8x32xf32>
    %55 = tpu.matmul %52, %54, %cst_44 {dimension_numbers = #tpu.dot_dimension_numbers<[1], [0], [0], [1], [0, 0, 1, 1], [], []>} : vector<8x8xf32>, vector<8x32xf32>, vector<8x32xf32> -> vector<8x32xf32>
    %56 = arith.addf %29, %55 : vector<8x32xf32>
    %c2 = arith.constant 2 : index
    %c0_45 = arith.constant 0 : index
    %c0_46 = arith.constant 0 : index
    %57 = vector.load %arg3[%c2, %c0_45, %c0_46] : memref<4x32x8xf32, #tpu.memory_space<vmem>>, vector<1x32x8xf32>
    %58 = vector.shape_cast %57 : vector<1x32x8xf32> to vector<32x8xf32>
    %cst_47 = arith.constant dense<0.000000e+00> : vector<8x8xf32>
    %59 = tpu.matmul %1, %58, %cst_47 {dimension_numbers = #tpu.dot_dimension_numbers<[1], [0], [0], [1], [0, 0, 1, 1], [], []>} : vector<8x32xf32>, vector<32x8xf32>, vector<8x8xf32> -> vector<8x8xf32>
    %c2_48 = arith.constant 2 : index
    %c0_49 = arith.constant 0 : index
    %c0_50 = arith.constant 0 : index
    %60 = vector.load %arg4[%c2_48, %c0_49, %c0_50] : memref<4x32x8xf32, #tpu.memory_space<vmem>>, vector<1x32x8xf32>
    %61 = vector.shape_cast %60 : vector<1x32x8xf32> to vector<32x8xf32>
    %cst_51 = arith.constant dense<0.000000e+00> : vector<16x8xf32>
    %62 = tpu.matmul %3, %61, %cst_51 {dimension_numbers = #tpu.dot_dimension_numbers<[1], [0], [0], [1], [0, 0, 1, 1], [], []>} : vector<16x32xf32>, vector<32x8xf32>, vector<16x8xf32> -> vector<16x8xf32>
    %c2_52 = arith.constant 2 : index
    %c0_53 = arith.constant 0 : index
    %c0_54 = arith.constant 0 : index
    %63 = vector.load %arg5[%c2_52, %c0_53, %c0_54] : memref<4x32x8xf32, #tpu.memory_space<vmem>>, vector<1x32x8xf32>
    %64 = vector.shape_cast %63 : vector<1x32x8xf32> to vector<32x8xf32>
    %cst_55 = arith.constant dense<0.000000e+00> : vector<16x8xf32>
    %65 = tpu.matmul %3, %64, %cst_55 {dimension_numbers = #tpu.dot_dimension_numbers<[1], [0], [0], [1], [0, 0, 1, 1], [], []>} : vector<16x32xf32>, vector<32x8xf32>, vector<16x8xf32> -> vector<16x8xf32>
    %cst_56 = arith.constant dense<0.000000e+00> : vector<8x16xf32>
    %66 = tpu.matmul %59, %62, %cst_56 {dimension_numbers = #tpu.dot_dimension_numbers<[1], [1], [0], [0], [0, 0, 1, 0], [], []>} : vector<8x8xf32>, vector<16x8xf32>, vector<8x16xf32> -> vector<8x16xf32>
    %cst_57 = arith.constant 0.353553385 : f32
    %67 = vector.broadcast %cst_57 : f32 to vector<8x16xf32>
    %68 = arith.mulf %66, %67 : vector<8x16xf32>
    %cst_58 = arith.constant dense<0xFF800000> : vector<8xf32>
    %69 = vector.multi_reduction <maximumf>, %68, %cst_58 [1] : vector<8x16xf32> to vector<8xf32>
    %70 = vector.shape_cast %69 : vector<8xf32> to vector<8x1xf32>
    %71 = vector.broadcast %70 : vector<8x1xf32> to vector<8x16xf32>
    %72 = arith.subf %68, %71 : vector<8x16xf32>
    %73 = math.exp %72 : vector<8x16xf32>
    %cst_59 = arith.constant dense<0.000000e+00> : vector<8xf32>
    %74 = vector.multi_reduction <add>, %73, %cst_59 [1] : vector<8x16xf32> to vector<8xf32>
    %75 = vector.shape_cast %74 : vector<8xf32> to vector<8x1xf32>
    %76 = tpu.reciprocal %75 : vector<8x1xf32> -> vector<8x1xf32>
    %77 = vector.broadcast %76 : vector<8x1xf32> to vector<8x16xf32>
    %78 = arith.mulf %73, %77 : vector<8x16xf32>
    %cst_60 = arith.constant dense<0.000000e+00> : vector<8x8xf32>
    %79 = tpu.matmul %78, %65, %cst_60 {dimension_numbers = #tpu.dot_dimension_numbers<[1], [0], [0], [1], [0, 0, 1, 1], [], []>} : vector<8x16xf32>, vector<16x8xf32>, vector<8x8xf32> -> vector<8x8xf32>
    %c2_61 = arith.constant 2 : index
    %c0_62 = arith.constant 0 : index
    %c0_63 = arith.constant 0 : index
    %80 = vector.load %arg6[%c2_61, %c0_62, %c0_63] : memref<4x8x32xf32, #tpu.memory_space<vmem>>, vector<1x8x32xf32>
    %81 = vector.shape_cast %80 : vector<1x8x32xf32> to vector<8x32xf32>
    %cst_64 = arith.constant dense<0.000000e+00> : vector<8x32xf32>
    %82 = tpu.matmul %79, %81, %cst_64 {dimension_numbers = #tpu.dot_dimension_numbers<[1], [0], [0], [1], [0, 0, 1, 1], [], []>} : vector<8x8xf32>, vector<8x32xf32>, vector<8x32xf32> -> vector<8x32xf32>
    %83 = arith.addf %56, %82 : vector<8x32xf32>
    %c3 = arith.constant 3 : index
    %c0_65 = arith.constant 0 : index
    %c0_66 = arith.constant 0 : index
    %84 = vector.load %arg3[%c3, %c0_65, %c0_66] : memref<4x32x8xf32, #tpu.memory_space<vmem>>, vector<1x32x8xf32>
    %85 = vector.shape_cast %84 : vector<1x32x8xf32> to vector<32x8xf32>
    %cst_67 = arith.constant dense<0.000000e+00> : vector<8x8xf32>
    %86 = tpu.matmul %1, %85, %cst_67 {dimension_numbers = #tpu.dot_dimension_numbers<[1], [0], [0], [1], [0, 0, 1, 1], [], []>} : vector<8x32xf32>, vector<32x8xf32>, vector<8x8xf32> -> vector<8x8xf32>
    %c3_68 = arith.constant 3 : index
    %c0_69 = arith.constant 0 : index
    %c0_70 = arith.constant 0 : index
    %87 = vector.load %arg4[%c3_68, %c0_69, %c0_70] : memref<4x32x8xf32, #tpu.memory_space<vmem>>, vector<1x32x8xf32>
    %88 = vector.shape_cast %87 : vector<1x32x8xf32> to vector<32x8xf32>
    %cst_71 = arith.constant dense<0.000000e+00> : vector<16x8xf32>
    %89 = tpu.matmul %3, %88, %cst_71 {dimension_numbers = #tpu.dot_dimension_numbers<[1], [0], [0], [1], [0, 0, 1, 1], [], []>} : vector<16x32xf32>, vector<32x8xf32>, vector<16x8xf32> -> vector<16x8xf32>
    %c3_72 = arith.constant 3 : index
    %c0_73 = arith.constant 0 : index
    %c0_74 = arith.constant 0 : index
    %90 = vector.load %arg5[%c3_72, %c0_73, %c0_74] : memref<4x32x8xf32, #tpu.memory_space<vmem>>, vector<1x32x8xf32>
    %91 = vector.shape_cast %90 : vector<1x32x8xf32> to vector<32x8xf32>
    %cst_75 = arith.constant dense<0.000000e+00> : vector<16x8xf32>
    %92 = tpu.matmul %3, %91, %cst_75 {dimension_numbers = #tpu.dot_dimension_numbers<[1], [0], [0], [1], [0, 0, 1, 1], [], []>} : vector<16x32xf32>, vector<32x8xf32>, vector<16x8xf32> -> vector<16x8xf32>
    %cst_76 = arith.constant dense<0.000000e+00> : vector<8x16xf32>
    %93 = tpu.matmul %86, %89, %cst_76 {dimension_numbers = #tpu.dot_dimension_numbers<[1], [1], [0], [0], [0, 0, 1, 0], [], []>} : vector<8x8xf32>, vector<16x8xf32>, vector<8x16xf32> -> vector<8x16xf32>
    %cst_77 = arith.constant 0.353553385 : f32
    %94 = vector.broadcast %cst_77 : f32 to vector<8x16xf32>
    %95 = arith.mulf %93, %94 : vector<8x16xf32>
    %cst_78 = arith.constant dense<0xFF800000> : vector<8xf32>
    %96 = vector.multi_reduction <maximumf>, %95, %cst_78 [1] : vector<8x16xf32> to vector<8xf32>
    %97 = vector.shape_cast %96 : vector<8xf32> to vector<8x1xf32>
    %98 = vector.broadcast %97 : vector<8x1xf32> to vector<8x16xf32>
    %99 = arith.subf %95, %98 : vector<8x16xf32>
    %100 = math.exp %99 : vector<8x16xf32>
    %cst_79 = arith.constant dense<0.000000e+00> : vector<8xf32>
    %101 = vector.multi_reduction <add>, %100, %cst_79 [1] : vector<8x16xf32> to vector<8xf32>
    %102 = vector.shape_cast %101 : vector<8xf32> to vector<8x1xf32>
    %103 = tpu.reciprocal %102 : vector<8x1xf32> -> vector<8x1xf32>
    %104 = vector.broadcast %103 : vector<8x1xf32> to vector<8x16xf32>
    %105 = arith.mulf %100, %104 : vector<8x16xf32>
    %cst_80 = arith.constant dense<0.000000e+00> : vector<8x8xf32>
    %106 = tpu.matmul %105, %92, %cst_80 {dimension_numbers = #tpu.dot_dimension_numbers<[1], [0], [0], [1], [0, 0, 1, 1], [], []>} : vector<8x16xf32>, vector<16x8xf32>, vector<8x8xf32> -> vector<8x8xf32>
    %c3_81 = arith.constant 3 : index
    %c0_82 = arith.constant 0 : index
    %c0_83 = arith.constant 0 : index
    %107 = vector.load %arg6[%c3_81, %c0_82, %c0_83] : memref<4x8x32xf32, #tpu.memory_space<vmem>>, vector<1x8x32xf32>
    %108 = vector.shape_cast %107 : vector<1x8x32xf32> to vector<8x32xf32>
    %cst_84 = arith.constant dense<0.000000e+00> : vector<8x32xf32>
    %109 = tpu.matmul %106, %108, %cst_84 {dimension_numbers = #tpu.dot_dimension_numbers<[1], [0], [0], [1], [0, 0, 1, 1], [], []>} : vector<8x8xf32>, vector<8x32xf32>, vector<8x32xf32> -> vector<8x32xf32>
    %110 = arith.addf %83, %109 : vector<8x32xf32>
    %c0_85 = arith.constant 0 : index
    %c0_86 = arith.constant 0 : index
    %c0_87 = arith.constant 0 : index
    %111 = vector.load %arg7[%c0_85, %c0_86, %c0_87] : memref<1x8x32xf32, #tpu.memory_space<vmem>>, vector<1x8x32xf32>
    %112 = vector.shape_cast %111 : vector<1x8x32xf32> to vector<8x32xf32>
    %113 = vector.shape_cast %110 : vector<8x32xf32> to vector<1x8x32xf32>
    tpu.vector_store %arg7[%c0_85, %c0_86, %c0_87], %113 {strides = array<i32>} : memref<1x8x32xf32, #tpu.memory_space<vmem>>, vector<1x8x32xf32>,
    return
  }
  func.func @transform_0(%arg0: i32) -> (i32, i32, i32) {
    %c0_i32 = arith.constant 0 : i32
    %c0_i32_0 = arith.constant 0 : i32
    %c0_i32_1 = arith.constant 0 : i32
    return %arg0, %c0_i32, %c0_i32_0 : i32, i32, i32
  }
  func.func @transform_1(%arg0: i32) -> (i32, i32, i32) {
    %c0_i32 = arith.constant 0 : i32
    %c0_i32_0 = arith.constant 0 : i32
    %c0_i32_1 = arith.constant 0 : i32
    return %arg0, %c0_i32, %c0_i32_0 : i32, i32, i32
  }
  func.func @transform_2(%arg0: i32) -> (i32, i32, i32) {
    %c0_i32 = arith.constant 0 : i32
    %c0_i32_0 = arith.constant 0 : i32
    %c0_i32_1 = arith.constant 0 : i32
    %c0_i32_2 = arith.constant 0 : i32
    return %c0_i32, %c0_i32_0, %c0_i32_1 : i32, i32, i32
  }
  func.func @transform_3(%arg0: i32) -> (i32, i32, i32) {
    %c0_i32 = arith.constant 0 : i32
    %c0_i32_0 = arith.constant 0 : i32
    %c0_i32_1 = arith.constant 0 : i32
    %c0_i32_2 = arith.constant 0 : i32
    return %c0_i32, %c0_i32_0, %c0_i32_1 : i32, i32, i32
  }
  func.func @transform_4(%arg0: i32) -> (i32, i32, i32) {
    %c0_i32 = arith.constant 0 : i32
    %c0_i32_0 = arith.constant 0 : i32
    %c0_i32_1 = arith.constant 0 : i32
    %c0_i32_2 = arith.constant 0 : i32
    return %c0_i32, %c0_i32_0, %c0_i32_1 : i32, i32, i32
  }
  func.func @transform_5(%arg0: i32) -> (i32, i32, i32) {
    %c0_i32 = arith.constant 0 : i32
    %c0_i32_0 = arith.constant 0 : i32
    %c0_i32_1 = arith.constant 0 : i32
    %c0_i32_2 = arith.constant 0 : i32
    return %c0_i32, %c0_i32_0, %c0_i32_1 : i32, i32, i32
  }
  func.func @transform_6(%arg0: i32) -> (i32, i32, i32) {
    %c0_i32 = arith.constant 0 : i32
    %c0_i32_0 = arith.constant 0 : i32
    %c0_i32_1 = arith.constant 0 : i32
    return %arg0, %c0_i32, %c0_i32_0 : i32, i32, i32
  }
}

</mosaic_0001>

<bundles_post_ra>
// kernel: tpu_custom_call.1
= control target key start
LH: loop header
LB: loop body
LE: loop exit
PB: predicated region body
PF: predicated region fallthrough
CT: control target
= control target key end

     0   :  { %11 = vsyncpa [#allocation3], 0  ;;  %s3340_s0 = inlined_call_operand.vmem [shape: f32[2,8,32], index: 0, kind: input, shape index: {}]   ;;  %s3341_s1 = inlined_call_operand.vmem [shape: f32[2,16,32], index: 1, kind: input, shape index: {}]   ;;  %s3342_s2 = inlined_call_operand.vmem [shape: f32[4,32,8], index: 2, kind: input, shape index: {}]   ;;  %s3343_s3 = inlined_call_operand.vmem [shape: f32[4,32,8], index: 3, kind: input, shape index: {}]   ;;  %s3344_s4 = inlined_call_operand.vmem [shape: f32[4,32,8], index: 4, kind: input, shape index: {}]   ;;  %s3345_s5 = inlined_call_operand.vmem [shape: f32[4,8,32], index: 5, kind: input, shape index: {}]   ;;  %s3346_s6 = inlined_call_operand.hbm [shape: f32[2,8,32], index: 6, kind: output, shape index: {}]  }
   0x1   :  { %13 = vsyncpa [#allocation3 + $0x1], 0  ;;  %s2945_s21 = smov 0   ;;  %s2947_s22 = smov 0  }
   0x2   :  { %s2949_s23 = smov 0   ;;  %s2951_s24 = smov 0  }
   0x3 LB: > { %s2966_s25 = sadd.s32 4294967295, %s2904_s24   ;;  %s2262_s26 = sadd.s32 4294967294, %s2904_s24   ;;  %s2904_s24 = sphi %s2951_s24, %s3354_s24   ;;  %s2900_s23 = sphi %s2949_s23, %s3353_s23   ;;  %s2896_s22 = sphi %s2947_s22, %s3352_s22   ;;  %s2892_s21 = sphi %s2945_s21, %s3351_s21  }
   0x4   : > { %s2970_s27 = sadd.s32 1, %s2904_s24   ;;  %s162_s28 = sadd.s32 1, %s2900_s23 }
   0x5   : > { %s159_s29 = ssub.s32 %s2904_s24, %s2970_s27  ;;  %p172_p0 = scmp.ne.s32.totalorder %s2900_s23, %s2896_s22 }
   0x6   : > { %p160_p1 = scmp.eq.s32.totalorder %s159_s29, 0  ;;  %p173_p2 = scmp.eq.s32.totalorder %s2966_s25, 1 }
   0x7   : > { %p178_p3 = scmp.ne.s32.totalorder %s2896_s22, %s2892_s21  ;;  %p179_p4 = scmp.eq.s32.totalorder %s2262_s26, 1 }
   0x8   : > { %s2981_s30 = scalar_select %p160_p1, %s2900_s23, %s162_s28  }
   0x9   : > { %p2983_p5 = por %p173_p2, %p172_p0  ;;  %p2987_p6 = por %p179_p4, %p178_p3 }
   0xa   : > { %p2265_p7 = scmp.ge.s32.totalorder %s2904_s24, 1  ;;  %p224_p8 = scmp.lt.s32.totalorder %s2904_s24, 3 }
   0xc   : > { %p225_p9 = pnand %p2265_p7, %p224_p8 }
   0xd   : > { %v348_v0 = vld [vmem:[%s3343_s3] sm:$0xff] (!%p225_p9)  ;;  %v349_v1 = vld [vmem:[%s3343_s3 + $0x8] sm:$0xff] (!%p225_p9)  ;;  %v350_v2 = vld [vmem:[%s3343_s3 + $0x10] sm:$0xff] (!%p225_p9)  ;;  %p258_p10 = scmp.lt.s32.totalorder (!%p225_p9), %s2966_s25, 1  ;;  %v2906_v5 = vmov (!%p225_p9), 0.0|0.0   ;;  %vm2907_vm0 = vmmov (!%p225_p9), 0  }
   0xe   : > { %228 = sbr.rel (%p225_p9) target bundleno = 3911 (0xf47), region = 44  ;;  %v2668_v3 = vpack.c.bf16 (!%p225_p9), %v349_v1, %v348_v0  ;;  %v351_v4 = vld [vmem:[%s3343_s3 + $0x18] sm:$0xff] (!%p225_p9)  ;;  %2662 = vmatprep.subr.bf16.mxu0 (!%p225_p9), %v2906_v5  ;;  %v270_v6 = vld [vmem:[%s3342_s2] sm:$0xff] (!%p225_p9)  ;;  %v271_v7 = vld [vmem:[%s3342_s2 + $0x8] sm:$0xff] (!%p225_p9)  ;;  %v2908_v12 = vmov (!%p225_p9), 0.0   ;;  %vm274_vm1 = vcmask (!%p225_p9), 261120  }
   0xf   : > { %v2672_v8 = vpack.c.bf16 (!%p225_p9), %v351_v4, %v350_v2  ;;  %v2663_v9 = vpack.c.bf16 (!%p225_p9), %v271_v7, %v270_v6  ;;  %v272_v10 = vld [vmem:[%s3342_s2 + $0x10] sm:$0xff] (!%p225_p9)  ;;  %v273_v11 = vld [vmem:[%s3342_s2 + $0x18] sm:$0xff] (!%p225_p9)  ;;  %2462 = vmatprep.mubr.msk.f32.mxu0 (!%p225_p9), %vm2907_vm0, %v2908_v12  ;;  %vm512_vm2 = vcmask (!%p225_p9), 64512   ;;  %v433_v23 = vld [vmem:[%s3344_s4] sm:$0xff] (!%p225_p9)  ;;  %vm593_vm4 = vcmask (!%p225_p9), 130048   ;;  %s255_s17 = sand.u32 (!%p225_p9), 1, %s2896_s22  }
  0x10   : > { %2669 = vmatprep.subr.bf16.mxu1 (!%p225_p9), %v2668_v3  ;;  %v2666_v13 = vpack.c.bf16 (!%p225_p9), %v273_v11, %v272_v10  ;;  %vm3048_vm3 = vmpackc.low (!%p225_p9), %vm512_vm2, %vm512_vm2  ;;  %v434_v24 = vld [vmem:[%s3344_s4 + $0x8] sm:$0xff] (!%p225_p9)  ;;  %v435_v25 = vld [vmem:[%s3344_s4 + $0x10] sm:$0xff] (!%p225_p9)  ;;  %s2350_s19 = sshll.u32 (!%p225_p9), %s2966_s25, 7  ;;  %s2178_s10 = scalar_lea.sflag (!%p225_p9), [#allocation3], %s255_s17 }
  0x11   : > { %2671 = vmatpush3.bf16.msra.mxu1 (!%p225_p9), %v2668_v3  ;;  %2664 = vmatpush3.bf16.msra.mxu0 (!%p225_p9), %v2663_v9  ;;  %v2676_v26 = vpack.c.bf16 (!%p225_p9), %v434_v24, %v433_v23  ;;  %v436_v27 = vld [vmem:[%s3344_s4 + $0x18] sm:$0xff] (!%p225_p9)  ;;  %v2284_v38 = vld [vmem:[%s3343_s3 + $0x20] sm:$0xff] (!%p225_p9)  ;;  %v2285_v39 = vld [vmem:[%s3343_s3 + $0x28] sm:$0xff] (!%p225_p9)  ;;  %s3297_s9 = scalar_lea.hbm (!%p225_p9), %s3346_s6, %s2350_s19 }
  0x12   : > { %2673 = vmatprep.subr.bf16.mxu1 (!%p225_p9), %v2672_v8  ;;  %2665 = vmatprep.subr.bf16.mxu0 (!%p225_p9), %v2906_v5  ;;  %v2680_v28 = vpack.c.bf16 (!%p225_p9), %v436_v27, %v435_v25  ;;  %v2697_v40 = vpack.c.bf16 (!%p225_p9), %v2285_v39, %v2284_v38  ;;  %v2286_v41 = vld [vmem:[%s3343_s3 + $0x30] sm:$0xff] (!%p225_p9)  ;;  %v2287_v42 = vld [vmem:[%s3343_s3 + $0x38] sm:$0xff] (!%p225_p9)  ;;  %v2279_v48 = vld [vmem:[%s3342_s2 + $0x20] sm:$0xff] (!%p225_p9) }
  0x13   : > { %v2701_v43 = vpack.c.bf16 (!%p225_p9), %v2287_v42, %v2286_v41  ;;  %v2280_v49 = vld [vmem:[%s3342_s2 + $0x28] sm:$0xff] (!%p225_p9)  ;;  %v2281_v53 = vld [vmem:[%s3342_s2 + $0x30] sm:$0xff] (!%p225_p9)  ;;  %v2282_v54 = vld [vmem:[%s3342_s2 + $0x38] sm:$0xff] (!%p225_p9) }
  0x14   : > { %v2692_v51 = vpack.c.bf16 (!%p225_p9), %v2280_v49, %v2279_v48  ;;  %v2695_v55 = vpack.c.bf16 (!%p225_p9), %v2282_v54, %v2281_v53  ;;  %v2290_v63 = vld [vmem:[%s3344_s4 + $0x20] sm:$0xff] (!%p225_p9)  ;;  %v2291_v0 = vld [vmem:[%s3344_s4 + $0x28] sm:$0xff] (!%p225_p9)  ;;  %v2292_v1 = vld [vmem:[%s3344_s4 + $0x30] sm:$0xff] (!%p225_p9) }
  0x15   : > { %s259_s26 = scalar_select %p258_p10, %s2966_s25, 1  ;;  %2675 = vmatpush3.bf16.msra.mxu1 %v2672_v8  ;;  %2667 = vmatpush3.bf16.msra.mxu0 %v2666_v13  ;;  %v2705_v2 = vpack.c.bf16 %v2291_v0, %v2290_v63  ;;  %v2293_v3 = vld [vmem:[%s3344_s4 + $0x38] sm:$0xff]  ;;  %v2300_v23 = vld [vmem:[%s3345_s5 + $0x8] sm:$0xff]  ;;  %v2303_v27 = vld [vmem:[%s3342_s2 + $0x40] sm:$0xff] }
  0x16   : > { %2684 = vmatprep.subr.bf16.mxu1 %v2906_v5  ;;  %2677 = vmatprep.subr.bf16.mxu0 %v2676_v26  ;;  %v2709_v4 = vpack.c.bf16 %v2293_v3, %v2292_v1  ;;  %v2310_v39 = vld [vmem:[%s3343_s3 + $0x50] sm:$0xff]  ;;  %v2315_v48 = vld [vmem:[%s3344_s4 + $0x48] sm:$0xff]  ;;  %s2909_s25 = smov [#allocation2]  }
  0x17   : > { %s2353_s11 = sshll.u32 %s259_s26, 4  ;;  %s2267_s12 = sshll.u32 %s259_s26, 3  ;;  %v2316_v49 = vld [vmem:[%s3344_s4 + $0x50] sm:$0xff] }
  0x18   : > { %s266_s15 = scalar_lea.vmem %s3341_s1, %s2353_s11  ;;  %s261_s18 = scalar_lea.vmem %s3340_s0, %s2267_s12  ;;  %v2324_v1 = vld [vmem:[%s3345_s5 + $0x10] sm:$0xff] }
  0x19   : > { %v3029_v14 = vld [vmem:[%s266_s15] sm:$0xff]  ;;  %v3033_v15 = vld [vmem:[%s266_s15 + $0x8] sm:$0xff]  ;;  %v2339_v20 = vld [vmem:[%s3344_s4 + $0x70] sm:$0xff]  ;;  %s2846_s12 = sshll.u32 %s2909_s25, 4  ;;  %s2847_s12 = int_to_ptr.vmem [resolvable:$false] %s2846_s12 }
  0x1a   : > { %2473 = vmatprep.mubr.msk.f32.mxu1 %vm274_vm1, %v3029_v14  ;;  %v3035_v16 = vld [vmem:[%s261_s18] sm:$0xff]  ;;  %s2266_s18 = sshll.u32 %s255_s17, 3  ;;  %s2848_s13 = scalar_lea.vmem %s2847_s12, 256 }
  0x1b   : > { %2474 = vmatmul.mubr.msk.f32.vlgmr.msra.gmra.mrb[0].mxu1 %vm274_vm1, %v3033_v15  ;;  %2463 = vmatmul.mubr.msk.f32.vlgmr.msra.gmra.mrb[0].mxu0 %vm274_vm1, %v3035_v16  ;;  %s257_s20 = scalar_lea.vmem [#allocation2], %s2266_s18 }
  0x1c   : > { %2491 = vmatprep.mubr.msk.f32.mxu1 %vm2907_vm0, %v2908_v12  ;;  %2484 = vmatprep.mubr.msk.f32.mxu0 %vm274_vm1, %v3029_v14  ;;  %s2191_s26 = sshll.u32 %s257_s20, 4  ;;  %s3299_s26 = int_to_ptr.vmem [resolvable:$true] %s2191_s26 }
  0x1d   : > { %2679 = vmatpush3.bf16.msra.mxu0 %v2676_v26  ;;  %s2842_s11 = scalar_lea.vmem %s3299_s26, 128  ;;  %p2849_p0 = scmp.lt.s32.totalorder %s3299_s26, %s2847_s12 }
  0x1e   : > { %2681 = vmatprep.subr.bf16.mxu0 %v2680_v28  ;;  %p2843_p11 = scmp.ne.s32.totalorder %s3299_s26, %s2842_s11  ;;  %p2850_p1 = scmp.lt.s32.totalorder %s2848_s13, %s2842_s11 }
  0x20   : > { %p2844_p12 = pnand %p2843_p11, %p2983_p5  ;;  %p2851_p2 = por %p2850_p1, %p2849_p0 }
  0x21   : > { %2683 = vmatpush3.bf16.msra.mxu0 %v2680_v28  ;;  %v2304_v28 = vld [vmem:[%s3342_s2 + $0x48] sm:$0xff] }
  0x22   : > { %2698 = vmatprep.subr.bf16.mxu0 %v2697_v40  ;;  %p2845_p13 = pneg %p2844_p12 }
  0x24   : > { %2485 = vmatmul.mubr.msk.f32.vlgmr.msra.gmra.mrb[2].mxu0 %vm274_vm1, %v3033_v15  ;;  %p2852_p3 = pnand %p2851_p2, %p2845_p13 }
  0x25   : > { %2520 = vmatprep.mubr.msk.f32.mxu0 %vm274_vm1, %v3029_v14  ;;  %2700 = vmatpush3.bf16.msra.mxu0 %v2697_v40  ;;  %v2311_v40 = vld [vmem:[%s3343_s3 + $0x58] sm:$0xff] }
  0x26   : > { %2702 = vmatprep.subr.bf16.mxu0 %v2701_v43  ;;  %v2730_v41 = vpack.c.bf16 %v2311_v40, %v2310_v39 }
  0x29   : > { %2704 = vmatpush3.bf16.msra.mxu0 %v2701_v43 }
  0x2a   : > { %2713 = vmatprep.subr.bf16.mxu0 %v2906_v5 }
  0x2c   : > { %2521 = vmatmul.mubr.msk.f32.vlgmr.msra.gmra.mrb[4].mxu0 %vm274_vm1, %v3033_v15 }
  0x2d   : > { %2538 = vmatprep.mubr.msk.f32.mxu0 %vm2907_vm0, %v2908_v12 }
  0xee   : > { %v2475_v17 = vpop.f32.mrb[0].mxu1  ;;  %v344_v18 = vpop.f32.mrb[0].mxu0 }
  0xef   : > { %v424_v19 = vpop.f32.mrb[1].mxu1  ;;  %v2464_v21 = vpop.f32.mrb[1].mxu0 }
  0xf0   : > { %v2685_v22 = vpack.c.bf16 %v2475_v17, %v424_v19 }
  0xf2   : > { %2687 = vmatpush3.bf16.xpose.msk.msra.mxu1 %vm3048_vm3, %v2685_v22 }
  0xf3   : > { %2688 = vmatprep.subr.bf16.mxu1 %v2906_v5 }
  0xf7   : > { %v2486_v44 = vpop.f32.mrb[2].mxu0 }
  0xf8   : > { %v503_v45 = vpop.f32.mrb[3].mxu0 }
  0xf9   : > { %2492 = vmatmul.mubr.msk.f32.vlgmr.msra.gmra.mrb[2].mxu1 %vm512_vm2, %v344_v18  ;;  %v2689_v46 = vpack.c.bf16 %v2486_v44, %v503_v45 }
  0xfa   : > { %2498 = vmatprep.mubr.msk.f32.mxu1 %vm2907_vm0, %v2908_v12 }
  0xfb   : > { %2690 = vmatpush3.bf16.msra.mxu1 %v2689_v46 }
  0xfc   : > { %2691 = vmatprep.subr.bf16.mxu1 %v2906_v5 }
  0xff   : > { %v2522_v56 = vpop.f32.mrb[4].mxu0 }
 0x100   : > { %v825_v57 = vpop.f32.mrb[5].mxu0 }
 0x101   : > { %v2714_v58 = vpack.c.bf16 %v2522_v56, %v825_v57 }
 0x103   : > { %2716 = vmatpush3.bf16.xpose.msk.msra.mxu0 %vm3048_vm3, %v2714_v58 }
 0x104   : > { %2548 = vmatprep.subr.mxu0 %v2908_v12 }
 0x1cc   : > { %v588_v29 = vpop.f32.mrb[2].mxu1 }
 0x1cd   : > { %v592_v30 = vmul.f32 0.35355338, %v588_v29  ;;  %v2493_v31 = vpop.f32.mrb[3].mxu1  ;;  %v2721_v29 = vpack.c.bf16 %v2304_v28, %v2303_v27 }
 0x1ce   : > { %v2306_v31 = vld [vmem:[%s3342_s2 + $0x58] sm:$0xff] }
 0x1cf   : > { %v594_v32 = vsel %vm593_vm4, %v592_v30, -inf }
 0x1d0   : > { %595 = vmax.xlane.f32.xlu0 %v594_v32 }
 0x25d   : > { %v596_v33 = vpop.xlane.xlu0 %595 }
 0x25e   : > { %v597_v34 = vsub.f32 %v592_v30, %v596_v33  ;;  %v2305_v30 = vld [vmem:[%s3342_s2 + $0x50] sm:$0xff]  ;;  %v2308_v33 = vld [vmem:[%s3343_s3 + $0x40] sm:$0xff] }
 0x25f   : > { %v2724_v32 = vpack.c.bf16 %v2306_v31, %v2305_v30  ;;  %v2340_v31 = vld [vmem:[%s3344_s4 + $0x78] sm:$0xff] }
 0x260   : > { %v598_v35 = vmul.f32 1.442695, %v597_v34  ;;  %v2309_v34 = vld [vmem:[%s3343_s3 + $0x48] sm:$0xff] }
 0x262   : > { %2826 = vpow2.f32 %v598_v35  ;;  %v678_v35 = vld [vmem:[%s3345_s5] sm:$0xff] }
 0x26c   : > { %v2827_v36 = vpop.eup %2826 }
 0x26d   : > { %v600_v37 = vsel %vm593_vm4, %v2827_v36, 0.0 }
 0x26e   : > { %601 = vadd.xlane.f32.xlu0 %v600_v37 }
 0x2fb   : > { %v602_v47 = vpop.xlane.xlu0 %601 }
 0x2fc   : > { %2828 = vrcp.f32 %v602_v47  ;;  %v2314_v47 = vld [vmem:[%s3344_s4 + $0x40] sm:$0xff] }
 0x306   : > { %v2829_v50 = vpop.eup %2828 }
 0x307   : > { %v604_v52 = vmul.f32 %v2829_v50, %v2827_v36  ;;  %v2726_v36 = vpack.c.bf16 %v2309_v34, %v2308_v33  ;;  %v2734_v50 = vpack.c.bf16 %v2315_v48, %v2314_v47 }
 0x309   : > { %2499 = vmatmul.mubr.msk.f32.vlgmr.msra.gmra.mrb[4].mxu1 %vm593_vm4, %v604_v52 }
 0x30a   : > { %2693 = vmatpush3.bf16.msra.mxu1 %v2692_v51  ;;  %2509 = vmatprep.mubr.msk.f32.mxu1 %vm2907_vm0, %v2908_v12  ;;  %v2317_v51 = vld [vmem:[%s3344_s4 + $0x58] sm:$0xff] }
 0x30b   : > { %2694 = vmatprep.subr.bf16.mxu1 %v2906_v5  ;;  %v2738_v52 = vpack.c.bf16 %v2317_v51, %v2316_v49 }
 0x30e   : > { %2696 = vmatpush3.bf16.msra.mxu1 %v2695_v55 }
 0x30f   : > { %2706 = vmatprep.subr.bf16.mxu1 %v2705_v2 }
 0x311   : > { %2510 = vmatmul.mubr.msk.f32.vlgmr.msra.gmra.mrb[6].mxu1 %vm274_vm1, %v3035_v16 }
 0x312   : > { %2531 = vmatprep.mubr.msk.f32.mxu1 %vm274_vm1, %v3029_v14  ;;  %2708 = vmatpush3.bf16.msra.mxu1 %v2705_v2 }
 0x313   : > { %2710 = vmatprep.subr.bf16.mxu1 %v2709_v4 }
 0x316   : > { %2712 = vmatpush3.bf16.msra.mxu1 %v2709_v4 }
 0x317   : > { %2717 = vmatprep.subr.bf16.mxu1 %v2906_v5 }
 0x319   : > { %2532 = vmatmul.mubr.msk.f32.vlgmr.msra.gmra.mrb[8].mxu1 %vm274_vm1, %v3033_v15 }
 0x31a   : > { %2545 = vmatprep.mubr.msk.f32.mxu1 %vm2907_vm0, %v2908_v12 }
 0x3dc   : > { %v3117_v59 = vpop.f32.mrb[4].mxu1 }
 0x3dd   : > { %v2500_v60 = vpop.f32.mrb[5].mxu1 }
 0x3e4   : > { %v750_v61 = vpop.f32.mrb[6].mxu1 }
 0x3e5   : > { %v2511_v62 = vpop.f32.mrb[7].mxu1  ;;  %2539 = vmatmul.mubr.msk.f32.vlgmr.msra.gmra.mrb[6].mxu0 %vm512_vm2, %v750_v61 }
 0x3e6   : > { %2550 = vmatprep.mubr.msk.f32.mxu0 %vm2907_vm0, %v2908_v12  ;;  %2549 = vmatpush3.msra.mxu0 %v2300_v23 }
 0x3e7   : > { %2553 = vmatprep.subr.mxu0 %v2908_v12 }
 0x3ec   : > { %v2533_v19 = vpop.f32.mrb[8].mxu1 }
 0x3ed   : > { %v905_v21 = vpop.f32.mrb[9].mxu1 }
 0x3ee   : > { %v2718_v22 = vpack.c.bf16 %v2533_v19, %v905_v21  ;;  %v2333_v19 = vld [vmem:[%s3343_s3 + $0x70] sm:$0xff]  ;;  %v2334_v21 = vld [vmem:[%s3343_s3 + $0x78] sm:$0xff] }
 0x3f0   : > { %2719 = vmatpush3.bf16.msra.mxu1 %v2718_v22  ;;  %v2759_v22 = vpack.c.bf16 %v2334_v21, %v2333_v19 }
 0x3f1   : > { %2720 = vmatprep.subr.bf16.mxu1 %v2906_v5 }
 0x4b8   : > { %v989_v6 = vpop.f32.mrb[6].mxu0 }
 0x4b9   : > { %v993_v7 = vmul.f32 0.35355338, %v989_v6  ;;  %v2540_v8 = vpop.f32.mrb[7].mxu0  ;;  %v2331_v6 = vld [vmem:[%s3343_s3 + $0x60] sm:$0xff] }
 0x4bb   : > { %v994_v9 = vsel %vm593_vm4, %v993_v7, -inf }
 0x4bc   : > { %995 = vmax.xlane.f32.xlu1 %v994_v9  ;;  %v2326_v9 = vld [vmem:[%s3342_s2 + $0x60] sm:$0xff] }
 0x549   : > { %v996_v10 = vpop.xlane.xlu1 %995 }
 0x54a   : > { %v997_v11 = vsub.f32 %v993_v7, %v996_v10  ;;  %v2332_v7 = vld [vmem:[%s3343_s3 + $0x68] sm:$0xff] }
 0x54b   : > { %v2755_v8 = vpack.c.bf16 %v2332_v7, %v2331_v6  ;;  %v2327_v10 = vld [vmem:[%s3342_s2 + $0x68] sm:$0xff] }
 0x54c   : > { %v998_v13 = vmul.f32 1.442695, %v997_v11  ;;  %v2750_v11 = vpack.c.bf16 %v2327_v10, %v2326_v9 }
 0x54e   : > { %2830 = vpow2.f32 %v998_v13  ;;  %v2328_v13 = vld [vmem:[%s3342_s2 + $0x70] sm:$0xff] }
 0x558   : > { %v2831_v17 = vpop.eup %2830 }
 0x559   : > { %v1000_v18 = vsel %vm593_vm4, %v2831_v17, 0.0 }
 0x55a   : > { %1001 = vadd.xlane.f32.xlu1 %v1000_v18 }
 0x5e7   : > { %v1002_v24 = vpop.xlane.xlu1 %1001 }
 0x5e8   : > { %2832 = vrcp.f32 %v1002_v24 }
 0x5f2   : > { %v2833_v25 = vpop.eup %2832 }
 0x5f3   : > { %v1004_v26 = vmul.f32 %v2833_v25, %v2831_v17  ;;  %v2329_v17 = vld [vmem:[%s3342_s2 + $0x78] sm:$0xff] }
 0x5f4   : > { %v2753_v18 = vpack.c.bf16 %v2329_v17, %v2328_v13 }
 0x5f5   : > { %2546 = vmatmul.mubr.msk.f32.vlgmr.msra.gmra.mrb[10].mxu1 %vm593_vm4, %v1004_v26 }
 0x5f6   : > { %2566 = vmatprep.mubr.msk.f32.mxu1 %vm2907_vm0, %v2908_v12  ;;  %2722 = vmatpush3.bf16.msra.mxu1 %v2721_v29  ;;  %v2338_v29 = vld [vmem:[%s3344_s4 + $0x68] sm:$0xff] }
 0x5f7   : > { %2723 = vmatprep.subr.bf16.mxu1 %v2906_v5 }
 0x5fa   : > { %2725 = vmatpush3.bf16.msra.mxu1 %v2724_v32  ;;  %v2767_v32 = vpack.c.bf16 %v2340_v31, %v2339_v20 }
 0x5fb   : > { %2735 = vmatprep.subr.bf16.mxu1 %v2734_v50 }
 0x5fd   : > { %2567 = vmatmul.mubr.msk.f32.vlgmr.msra.gmra.mrb[12].mxu1 %vm274_vm1, %v3035_v16 }
 0x5fe   : > { %2588 = vmatprep.mubr.msk.f32.mxu1 %vm274_vm1, %v3029_v14  ;;  %2737 = vmatpush3.bf16.msra.mxu1 %v2734_v50 }
 0x5ff   : > { %2739 = vmatprep.subr.bf16.mxu1 %v2738_v52 }
 0x602   : > { %2741 = vmatpush3.bf16.msra.mxu1 %v2738_v52 }
 0x603   : > { %2746 = vmatprep.subr.bf16.mxu1 %v2906_v5 }
 0x605   : > { %2589 = vmatmul.mubr.msk.f32.vlgmr.msra.gmra.mrb[14].mxu1 %vm274_vm1, %v3033_v15 }
 0x606   : > { %2602 = vmatprep.mubr.msk.f32.mxu1 %vm2907_vm0, %v2908_v12 }
 0x6c8   : > { %v1074_v37 = vpop.f32.mrb[10].mxu1 }
 0x6c9   : > { %v2547_v38 = vpop.f32.mrb[11].mxu1  ;;  %2551 = vmatmul.mubr.msk.f32.vlgmr.msra.gmra.mrb[8].mxu0 %vm512_vm2, %v1074_v37 }
 0x6ca   : > { %2554 = vmatpush3.msra.mxu0 %v678_v35  ;;  %2555 = vmatprep.mubr.msk.f32.mxu0 %vm2907_vm0, %v2908_v12 }
 0x6cb   : > { %2727 = vmatprep.subr.bf16.mxu0 %v2726_v36 }
 0x6d0   : > { %v1297_v42 = vpop.f32.mrb[12].mxu1 }
 0x6d1   : > { %2556 = vmatmul.mubr.msk.f32.vlgmr.msra.gmra.mrb[8].mxu0 %vm512_vm2, %v3117_v59  ;;  %v2568_v43 = vpop.f32.mrb[13].mxu1 }
 0x6d2   : > { %2729 = vmatpush3.bf16.msra.mxu0 %v2726_v36  ;;  %2577 = vmatprep.mubr.msk.f32.mxu0 %vm274_vm1, %v3029_v14 }
 0x6d3   : > { %2731 = vmatprep.subr.bf16.mxu0 %v2730_v41 }
 0x6d6   : > { %2733 = vmatpush3.bf16.msra.mxu0 %v2730_v41 }
 0x6d7   : > { %2742 = vmatprep.subr.bf16.mxu0 %v2906_v5 }
 0x6d8   : > { %v2590_v62 = vpop.f32.mrb[14].mxu1 }
 0x6d9   : > { %2578 = vmatmul.mubr.msk.f32.vlgmr.msra.gmra.mrb[10].mxu0 %vm274_vm1, %v3033_v15  ;;  %v1452_v63 = vpop.f32.mrb[15].mxu1 }
 0x6da   : > { %2595 = vmatprep.mubr.msk.f32.mxu0 %vm2907_vm0, %v2908_v12  ;;  %v2747_v0 = vpack.c.bf16 %v2590_v62, %v1452_v63 }
 0x6dc   : > { %2748 = vmatpush3.bf16.msra.mxu1 %v2747_v0 }
 0x6dd   : > { %2749 = vmatprep.subr.bf16.mxu1 %v2906_v5 }
 0x7ac   : > { %v2579_v44 = vpop.f32.mrb[10].mxu0 }
 0x7ad   : > { %v1372_v45 = vpop.f32.mrb[11].mxu0 }
 0x7ae   : > { %v2743_v46 = vpack.c.bf16 %v2579_v44, %v1372_v45 }
 0x7b0   : > { %2745 = vmatpush3.bf16.xpose.msk.msra.mxu0 %vm3048_vm3, %v2743_v46 }
 0x7b1   : > { %2605 = vmatprep.subr.mxu0 %v2908_v12 }
 0x7b7   : > { %2596 = vmatmul.mubr.msk.f32.vlgmr.msra.gmra.mrb[12].mxu0 %vm512_vm2, %v1297_v42 }
 0x7b8   : > { %2607 = vmatprep.mubr.msk.f32.mxu0 %vm2907_vm0, %v2908_v12  ;;  %2606 = vmatpush3.msra.mxu0 %v2324_v1 }
 0x7b9   : > { %2756 = vmatprep.subr.bf16.mxu0 %v2755_v8 }
 0x88a   : > { %v1536_v53 = vpop.f32.mrb[12].mxu0 }
 0x88b   : > { %v1540_v54 = vmul.f32 0.35355338, %v1536_v53  ;;  %v2597_v55 = vpop.f32.mrb[13].mxu0 }
 0x88d   : > { %v1541_v56 = vsel %vm593_vm4, %v1540_v54, -inf }
 0x88e   : > { %1542 = vmax.xlane.f32.xlu0 %v1541_v56 }
 0x91b   : > { %v1543_v57 = vpop.xlane.xlu0 %1542 }
 0x91c   : > { %v1544_v58 = vsub.f32 %v1540_v54, %v1543_v57 }
 0x91e   : > { %v1545_v59 = vmul.f32 1.442695, %v1544_v58 }
 0x920   : > { %2834 = vpow2.f32 %v1545_v59 }
 0x92a   : > { %v2835_v60 = vpop.eup %2834 }
 0x92b   : > { %v1547_v61 = vsel %vm593_vm4, %v2835_v60, 0.0 }
 0x92c   : > { %1548 = vadd.xlane.f32.xlu1 %v1547_v61 }
 0x9b9   : > { %v1549_v2 = vpop.xlane.xlu1 %1548 }
 0x9ba   : > { %2836 = vrcp.f32 %v1549_v2 }
 0x9c4   : > { %v2837_v3 = vpop.eup %2836 }
 0x9c5   : > { %v1551_v4 = vmul.f32 %v2837_v3, %v2835_v60 }
 0x9c7   : > { %2603 = vmatmul.mubr.msk.f32.vlgmr.msra.gmra.mrb[16].mxu1 %vm593_vm4, %v1551_v4 }
 0x9c8   : > { %2618 = vmatprep.mubr.msk.f32.mxu1 %vm2907_vm0, %v2908_v12  ;;  %2751 = vmatpush3.bf16.msra.mxu1 %v2750_v11 }
 0x9c9   : > { %2752 = vmatprep.subr.bf16.mxu1 %v2906_v5 }
 0x9cc   : > { %2754 = vmatpush3.bf16.msra.mxu1 %v2753_v18 }
 0x9cf   : > { %2619 = vmatmul.mubr.msk.f32.vlgmr.msra.gmra.mrb[18].mxu1 %vm274_vm1, %v3035_v16 }
 0x9d0   : > { %2640 = vmatprep.mubr.msk.f32.mxu1 %vm274_vm1, %v3029_v14 }
 0xa9a   : > { %v1621_v23 = vpop.f32.mrb[16].mxu1 }
 0xa9b   : > { %v2604_v24 = vpop.f32.mrb[17].mxu1  ;;  %2608 = vmatmul.mubr.msk.f32.vlgmr.msra.gmra.mrb[8].mxu0 %vm512_vm2, %v1621_v23 }
 0xa9c   : > { %2758 = vmatpush3.bf16.msra.mxu0 %v2755_v8  ;;  %2629 = vmatprep.mubr.msk.f32.mxu0 %vm274_vm1, %v3029_v14  ;;  %v2337_v14 = vld [vmem:[%s3344_s4 + $0x60] sm:$0xff] }
 0xa9d   : > { %2760 = vmatprep.subr.bf16.mxu0 %v2759_v22  ;;  %v2763_v30 = vpack.c.bf16 %v2338_v29, %v2337_v14 }
 0xa9f   : > { %2764 = vmatprep.subr.bf16.mxu1 %v2763_v30 }
 0xaa0   : > { %2762 = vmatpush3.bf16.msra.mxu0 %v2759_v22  ;;  %2766 = vmatpush3.bf16.msra.mxu1 %v2763_v30 }
 0xaa1   : > { %2771 = vmatprep.subr.bf16.mxu0 %v2906_v5  ;;  %2768 = vmatprep.subr.bf16.mxu1 %v2767_v32 }
 0xaa2   : > { %v1772_v16 = vpop.f32.mrb[18].mxu1 }
 0xaa3   : > { %2630 = vmatmul.mubr.msk.f32.vlgmr.msra.gmra.mrb[14].mxu0 %vm274_vm1, %v3033_v15  ;;  %v2620_v25 = vpop.f32.mrb[19].mxu1 }
 0xaa4   : > { %2647 = vmatprep.mubr.msk.f32.mxu0 %vm2907_vm0, %v2908_v12  ;;  %2770 = vmatpush3.bf16.msra.mxu1 %v2767_v32 }
 0xaa5   : > { %2775 = vmatprep.subr.bf16.mxu1 %v2906_v5 }
 0xaa7   : > { %2641 = vmatmul.mubr.msk.f32.vlgmr.msra.gmra.mrb[20].mxu1 %vm274_vm1, %v3033_v15 }
 0xaa8   : > { %2654 = vmatprep.mubr.msk.f32.mxu1 %vm2907_vm0, %v2908_v12 }
 0xb76   : > { %v2631_v26 = vpop.f32.mrb[14].mxu0 }
 0xb77   : > { %v1847_v27 = vpop.f32.mrb[15].mxu0 }
 0xb78   : > { %v2772_v28 = vpack.c.bf16 %v2631_v26, %v1847_v27 }
 0xb7a   : > { %2774 = vmatpush3.bf16.xpose.msk.msra.mxu0 %vm3048_vm3, %v2772_v28  ;;  %v2642_v5 = vpop.f32.mrb[20].mxu1 }
 0xb7b   : > { %2657 = vmatprep.subr.mxu0 %v2908_v12  ;;  %v1927_v15 = vpop.f32.mrb[21].mxu1 }
 0xb7c   : > { %v2776_v42 = vpack.c.bf16 %v2642_v5, %v1927_v15 }
 0xb7e   : > { %2777 = vmatpush3.bf16.msra.mxu1 %v2776_v42 }
 0xb81   : > { %2648 = vmatmul.mubr.msk.f32.vlgmr.msra.gmra.mrb[16].mxu0 %vm512_vm2, %v1772_v16 }
 0xb82   : > { %2659 = vmatprep.mubr.msk.f32.mxu0 %vm2907_vm0, %v2908_v12  ;;  %v2347_v12 = vld [vmem:[%s3345_s5 + $0x18] sm:$0xff] }
 0xb83   : > { %2658 = vmatpush3.msra.mxu0 %v2347_v12 }
 0xc54   : > { %v2011_v33 = vpop.f32.mrb[16].mxu0 }
 0xc55   : > { %v2015_v34 = vmul.f32 0.35355338, %v2011_v33  ;;  %v2649_v35 = vpop.f32.mrb[17].mxu0 }
 0xc57   : > { %v2016_v36 = vsel %vm593_vm4, %v2015_v34, -inf }
 0xc58   : > { %2017 = vmax.xlane.f32.xlu0 %v2016_v36 }
 0xce5   : > { %v2018_v37 = vpop.xlane.xlu0 %2017 }
 0xce6   : > { %v2019_v38 = vsub.f32 %v2015_v34, %v2018_v37 }
 0xce8   : > { %v2020_v39 = vmul.f32 1.442695, %v2019_v38 }
 0xcea   : > { %2838 = vpow2.f32 %v2020_v39 }
 0xcf4   : > { %v2839_v40 = vpop.eup %2838 }
 0xcf5   : > { %v2022_v41 = vsel %vm593_vm4, %v2839_v40, 0.0 }
 0xcf6   : > { %2023 = vadd.xlane.f32.xlu1 %v2022_v41 }
 0xd83   : > { %v2024_v43 = vpop.xlane.xlu1 %2023 }
 0xd84   : > { %2840 = vrcp.f32 %v2024_v43 }
 0xd8e   : > { %v2841_v44 = vpop.eup %2840 }
 0xd8f   : > { %v2026_v45 = vmul.f32 %v2841_v44, %v2839_v40 }
 0xd91   : > { %2655 = vmatmul.mubr.msk.f32.vlgmr.msra.gmra.mrb[22].mxu1 %vm593_vm4, %v2026_v45 }
 0xe64   : > { %v2096_v46 = vpop.f32.mrb[22].mxu1 }
 0xe65   : > { %v2656_v47 = vpop.f32.mrb[23].mxu1  ;;  %2660 = vmatmul.mubr.msk.f32.vlgmr.msra.gmra.mrb[8].mxu0 %vm512_vm2, %v2096_v46 }
 0xf38   : > { %v2171_v48 = vpop.f32.mrb[8].mxu0 }
 0xf39   : > { %2176 = vst.msk [vmem:[%s257_s20] sm:$0xff] %vm274_vm1, %v2171_v48  ;;  %v2661_v49 = vpop.f32.mrb[9].mxu0 }
 0xf3a   : > { %2855 = shalt.err (!%p2852_p3)
}
 0xf3b   : > { %s2856_s14 = scalar_lea.hbm %s3297_s9, 128  ;;  %s2860_s17 = scalar_lea.hbm %s3346_s6, 256 }
 0xf3c   : > { %p2857_p4 = scmp.ne.s32.totalorder %s3297_s9, %s2856_s14  ;;  %p2861_p9 = scmp.lt.u32.totalorder %s3297_s9, %s3346_s6 }
 0xf3d   : > { %p2862_p10 = scmp.lt.u32.totalorder %s2860_s17, %s2856_s14  ;;  %p2864_p12 = scmp.lt.u32.totalorder %s2856_s14, %s3297_s9 }
 0xf3e   : > { %p2858_p7 = pnand %p2857_p4, %p2983_p5 }
 0xf3f   : > { %p2863_p11 = por %p2862_p10, %p2861_p9 }
 0xf40   : > { %p2859_p8 = pneg %p2858_p7 }
 0xf41   : > { %p2865_p13 = por %p2864_p12, %p2863_p11 }
 0xf43   : > { %p2866_p0 = pnand %p2865_p13, %p2859_p8 }
 0xf45   : > { %2869 = shalt.err (!%p2866_p0)
}
 0xf46   : > { %2784 = dma.vmem_to_hbm [thread:$0]  (%p2983_p5), %s3299_s26, 128, %s3297_s9, %s2178_s10  }
 0xf47 PF: > { %p2790_p1 = scmp.ge.s32.totalorder %s2904_s24, 2  ;;  %s2203_s20 = sand.u32 1, %s2892_s21  }
 0xf48   : > { %s2204_s28 = scalar_lea.sflag [#allocation3], %s2203_s20 }
 0xf49   : > { %p2787_p2 = pnand %p2790_p1, %p2987_p6 }
 0xf4b   : > { %2887 = dma.done.wait (!%p2787_p2), %s2204_s28, 128  }
 0xf4c   : > { %2889 = vsyncadd (!%p2787_p2), %s2204_s28, 4294967168  ;;  %p16_p3 = scmp.ge.s32.totalorder %s2970_s27, 4   ;;  %s3351_s21 = smov %s2896_s22 }
 0xf4d   : > { %s3352_s22 = smov %s2900_s23  ;;  %s3353_s23 = smov %s2981_s30 }
 0xf4e   : > { %s3354_s24 = smov %s2970_s27  ;;  %18 = sbr.rel (!%p16_p3) target bundleno = 3 (0x3), region = 94 }
 0xf55   :  { %2209 = vsyncpa [#allocation3], 1 }
 0xf56   :  { %2211 = vsyncpa [#allocation3 + $0x1], 1 }

</bundles_post_ra>
